<compile_context>
chip_gen: v7x
topology: tpu7x:2x2x1
jax: 0.10.0
libtpu: 0.0.40
codegen_flags: <defaults>
</compile_context>

<pallas_src>
import jax
import jax.numpy as jnp
from jax import lax
from jax.experimental import pallas as pl
from jax.experimental.pallas import tpu as pltpu

BN_EPS = 1e-5


def _round_up(v, m):
    return (v + m - 1) // m * m


def _vmem_estimate(th, W, Cin, Cout):
    """Rough double-buffered VMEM footprint (bytes) for one grid step."""
    x_blk = (th + 2) * _round_up(W + 2, 16) * _round_up(Cin, 128) * 2   # bf16, lane-padded
    o_blk = th * W * _round_up(Cout, 128) * 4                           # f32 out tile
    w_blk = 9 * _round_up(Cin, 16) * _round_up(Cout, 128) * 2
    return 2 * x_blk + 2 * o_blk + w_blk + (2 << 20)                    # + slack


def multibranch_block(x_nchw, w1_oihw, w3_oihw, gamma1, beta1, gamma3, beta3,
                      *, max_rows_per_tile=2048, vmem_budget=24 * 1024 * 1024):
    """NCHW in, NCHW out (matches the PyTorch module, BatchNorm in training mode)."""
    N, Cin, H, W = x_nchw.shape
    C1 = w1_oihw.shape[0]
    C3 = w3_oihw.shape[0]
    Cout = C1 + C3
    M = N * H * W

    # The in-kernel (TH, W, Cin) -> (TH*W, Cin) collapse needs W to be a sublane
    # multiple.  TODO(synk): pad W (and mask the padded output columns out of the
    # BN statistics) to support arbitrary widths.
    assert W % 8 == 0, "kernel requires W % 8 == 0"

    # ---- pick the per-step row tile: largest divisor of H under the row target
    # ---- and an explicit VMEM budget (v7x has only 64 MiB VMEM).
    target_th = max(1, max_rows_per_tile // W)
    TH = 1
    for d in range(1, H + 1):
        if H % d == 0 and d <= target_th and _vmem_estimate(d, W, Cin, Cout) <= vmem_budget:
            TH = d
    nT = H // TH
    T = N * nT                 # grid size (tiles)
    rows = TH * W              # conv rows produced per grid step

    # ---- padded NHWC activations in bf16, with per-tile H halos ----------------
    x_nhwc = jnp.transpose(x_nchw, (0, 2, 3, 1)).astype(jnp.bfloat16)
    xp = jnp.pad(x_nhwc, ((0, 0), (1, 1), (1, 1), (0, 0)))       # (N, H+2, W+2, Cin)
    if nT == 1:
        x_tiles = xp                                              # no extra copy
    else:
        # Overlapping row tiles (halo of 1 row each side): ~(TH+2)/TH read
        # amplification instead of the 9x of an im2col slab.
        x_tiles = jnp.stack([xp[:, t * TH:t * TH + TH + 2] for t in range(nT)], axis=1)
    x_tiles = x_tiles.reshape(T, TH + 2, W + 2, Cin)

    # ---- fused per-tap weight (9, Cin, Cout): 1x1 branch only in the centre tap
    w3_taps = jnp.transpose(w3_oihw, (2, 3, 1, 0)).reshape(9, Cin, C3).astype(jnp.float32)
    w1_taps = jnp.zeros((9, Cin, C1), jnp.float32).at[4].set(
        w1_oihw[:, :, 0, 0].T.astype(jnp.float32))
    w_comb = jnp.concatenate([w1_taps, w3_taps], axis=-1).astype(jnp.bfloat16)

    gamma = jnp.concatenate([gamma1, gamma3]).astype(jnp.float32).reshape(1, Cout)
    beta = jnp.concatenate([beta1, beta3]).astype(jnp.float32).reshape(1, Cout)

    # ---- in-kernel conv tile: 9 tap matmuls, bf16 operands, f32 accumulation ---
    def conv_tile(x_ref, w_ref):
        xb = x_ref[0].astype(jnp.float32)                 # (TH+2, W+2, Cin)
        acc = None
        for t, (dy, dx) in enumerate([(dy, dx) for dy in range(3) for dx in range(3)]):
            tap = xb[dy:dy + TH, dx:dx + W, :].reshape(rows, Cin).astype(jnp.bfloat16)
            part = jnp.dot(tap, w_ref[t], preferred_element_type=jnp.float32)
            acc = part if acc is None else acc + part
        return acc                                        # (rows, Cout) f32

    # Phase 1: per-tile partial channel sums / sums of squares.  Each grid step
    # writes its own output block, so the axis is fully "parallel" (v7x 2-TC).
    # TH | H means there are no padded rows, so the statistics are exact.
    def stats_kernel(x_ref, w_ref, sum_ref, sqsum_ref):
        y = conv_tile(x_ref, w_ref)
        sum_ref[...] = jnp.sum(y, axis=0, keepdims=True).reshape(1, 1, Cout)
        sqsum_ref[...] = jnp.sum(y * y, axis=0, keepdims=True).reshape(1, 1, Cout)

    # Phase 2: recompute the cheap conv and apply the folded BN affine + ReLU
    # with a narrow (rows, Cout) store.
    def bn_relu_kernel(x_ref, w_ref, scale_ref, shift_ref, o_ref):
        y = conv_tile(x_ref, w_ref)
        o_ref[...] = jnp.maximum(y * scale_ref[...] + shift_ref[...],
                                 0.0).astype(o_ref.dtype)

    x_spec = pl.BlockSpec((1, TH + 2, W + 2, Cin), lambda i: (i, 0, 0, 0))
    w_spec = pl.BlockSpec((9, Cin, Cout), lambda i: (0, 0, 0))
    stat_spec = pl.BlockSpec((1, 1, Cout), lambda i: (i, 0, 0))
    vec_spec = pl.BlockSpec((1, Cout), lambda i: (0, 0))
    out_spec = pl.BlockSpec((rows, Cout), lambda i: (i, 0))
    # TODO(synk): if profiling on v5e shows exposed input DMA at large TH, add
    # pipeline_mode=pl.Buffered(3) to x_spec / out_spec.

    vmem_limit = int(min(64 * 1024 * 1024,
                         max(32 * 1024 * 1024, 3 * _vmem_estimate(TH, W, Cin, Cout))))
    cparams = pltpu.CompilerParams(dimension_semantics=("parallel",),
                                   vmem_limit_bytes=vmem_limit)

    tile_sum, tile_sqsum = pl.pallas_call(
        stats_kernel,
        out_shape=(jax.ShapeDtypeStruct((T, 1, Cout), jnp.float32),
                   jax.ShapeDtypeStruct((T, 1, Cout), jnp.float32)),
        grid_spec=pltpu.PrefetchScalarGridSpec(
            num_scalar_prefetch=0, grid=(T,),
            in_specs=[x_spec, w_spec],
            out_specs=[stat_spec, stat_spec]),
        compiler_params=cparams,
    )(x_tiles, w_comb)

    # Fold training-mode BatchNorm into a per-channel scale + shift.
    # NOTE: E[x^2] - mean^2 in f32 can cancel when |mean| >> std; acceptable at
    # these scales (matches the reference), revisit for production inputs.
    ch_sum = jnp.sum(tile_sum, axis=(0, 1))                   # (Cout,)
    ch_sqsum = jnp.sum(tile_sqsum, axis=(0, 1))
    mean = ch_sum / jnp.float32(M)
    var = jnp.maximum(ch_sqsum / jnp.float32(M) - mean * mean, 0.0)
    scale = gamma * lax.rsqrt(var + BN_EPS).reshape(1, Cout)
    shift = beta - mean.reshape(1, Cout) * scale

    out2d = pl.pallas_call(
        bn_relu_kernel,
        out_shape=jax.ShapeDtypeStruct((T * rows, Cout), x_nchw.dtype),
        grid_spec=pltpu.PrefetchScalarGridSpec(
            num_scalar_prefetch=0, grid=(T,),
            in_specs=[x_spec, w_spec, vec_spec, vec_spec],
            out_specs=out_spec),
        compiler_params=cparams,
    )(x_tiles, w_comb, scale, shift)

    # Rows are ordered (n, h, w) because TH | H, so this is a pure reshape.
    # TODO(synk): returning NHWC would save the final transpose pass over the
    # output if the consumer allows it.
    out_nhwc = out2d.reshape(N, H, W, Cout)
    return jnp.transpose(out_nhwc, (0, 3, 1, 2))


def reference(x, w1, w3, g1, b1, g3, b3):
    """Pure-JAX reference mirroring the PyTorch forward (BN training mode)."""
    dn = ("NCHW", "OIHW", "NCHW")
    c1 = lax.conv_general_dilated(x, w1, (1, 1), "VALID", dimension_numbers=dn)
    c3 = lax.conv_general_dilated(x, w3, (1, 1), [(1, 1), (1, 1)],
                                  dimension_numbers=dn)

    def bn_relu(y, g, b):
        m = jnp.mean(y, axis=(0, 2, 3), keepdims=True)
        v = jnp.mean((y - m) ** 2, axis=(0, 2, 3), keepdims=True)
        yhat = (y - m) / jnp.sqrt(v + BN_EPS)
        return jnp.maximum(g.reshape(1, -1, 1, 1) * yhat +
                           b.reshape(1, -1, 1, 1), 0.0)

    return jnp.concatenate([bn_relu(c1, g1, b1), bn_relu(c3, g3, b3)], axis=1)


if __name__ == "__main__":
    # Shapes consistent with the module: input_shape=(4, 16, 16),
    # channels_1x1=8, channels_3x3=16, batch=2.
    N, Cin, H, W = 2, 4, 16, 16
    C1, C3 = 8, 16

    key = jax.random.PRNGKey(0)
    kx, kw1, kw3 = jax.random.split(key, 3)

    # Pre-round activations/weights to bf16-representable values so the kernel's
    # bf16 MXU path can be checked against an f32 reference at tight tolerance.
    def q(a):
        return a.astype(jnp.bfloat16).astype(jnp.float32)

    x = q(jax.random.normal(kx, (N, Cin, H, W), dtype=jnp.float32))
    w1 = q(0.1 * jax.random.normal(kw1, (C1, Cin, 1, 1), dtype=jnp.float32))
    w3 = q(0.1 * jax.random.normal(kw3, (C3, Cin, 3, 3), dtype=jnp.float32))
    gamma1 = 1.0 + 0.05 * jnp.arange(C1, dtype=jnp.float32)
    beta1 = 0.02 * jnp.arange(C1, dtype=jnp.float32)
    gamma3 = 1.0 - 0.01 * jnp.arange(C3, dtype=jnp.float32)
    beta3 = -0.03 * jnp.arange(C3, dtype=jnp.float32)

    # max_rows_per_tile=128 -> TH=8: two row-tiles per image, 4-step grid, so the
    # halo-tile build path and the cross-tile statistics reduction are exercised.
    out = multibranch_block(x, w1, w3, gamma1, beta1, gamma3, beta3,
                            max_rows_per_tile=128)
    out = jax.block_until_ready(out)

    ref = jax.block_until_ready(reference(x, w1, w3, gamma1, beta1,
                                          gamma3, beta3))

    assert out.shape == (N, C1 + C3, H, W), out.shape
    max_err = float(jnp.max(jnp.abs(out - ref)))
    assert jnp.allclose(out, ref, atol=2e-3, rtol=2e-3), max_err

    print("KERNEL_OK")
</pallas_src>

<mosaic_0001>
module attributes {stable_mosaic.version = 11 : i64} {
  func.func @stats_kernel(%arg0: i32, %arg1: memref<1x10x18x4xbf16, #tpu.memory_space<vmem>>, %arg2: memref<9x4x24xbf16, #tpu.memory_space<vmem>>, %arg3: memref<1x1x24xf32, #tpu.memory_space<vmem>>, %arg4: memref<1x1x24xf32, #tpu.memory_space<vmem>>) attributes {dimension_semantics = [#tpu.dimension_semantics<parallel>], iteration_bounds = array<i64: 4>, scalar_prefetch = 0 : i64, scratch_operands = 0 : i64, tpu.core_type = #tpu.core_type<tc>, window_params = [{transform_indices = @transform_0, window_bounds = array<i64: 1, 10, 18, 4>}, {pipeline_mode = #tpu.pipeline_mode<synchronous>, transform_indices = @transform_1, window_bounds = array<i64: 9, 4, 24>}, {transform_indices = @transform_2, window_bounds = array<i64: 1, 1, 24>}, {transform_indices = @transform_3, window_bounds = array<i64: 1, 1, 24>}]} {
    %c0 = arith.constant 0 : index
    %c0_0 = arith.constant 0 : index
    %c0_1 = arith.constant 0 : index
    %c0_2 = arith.constant 0 : index
    %0 = vector.load %arg1[%c0, %c0_0, %c0_1, %c0_2] : memref<1x10x18x4xbf16, #tpu.memory_space<vmem>>, vector<1x10x18x4xbf16>
    %1 = vector.shape_cast %0 : vector<1x10x18x4xbf16> to vector<10x18x4xbf16>
    %2 = arith.extf %1 : vector<10x18x4xbf16> to vector<10x18x4xf32>
    %3 = vector.extract_strided_slice %2 {offsets = [0, 0, 0], sizes = [8, 16, 4], strides = [1, 1, 1]} : vector<10x18x4xf32> to vector<8x16x4xf32>
    %4 = vector.shape_cast %3 : vector<8x16x4xf32> to vector<128x4xf32>
    %5 = arith.truncf %4 : vector<128x4xf32> to vector<128x4xbf16>
    %c0_3 = arith.constant 0 : index
    %c0_4 = arith.constant 0 : index
    %c0_5 = arith.constant 0 : index
    %6 = vector.load %arg2[%c0_3, %c0_4, %c0_5] : memref<9x4x24xbf16, #tpu.memory_space<vmem>>, vector<1x4x24xbf16>
    %7 = vector.shape_cast %6 : vector<1x4x24xbf16> to vector<4x24xbf16>
    %cst = arith.constant dense<0.000000e+00> : vector<128x24xf32>
    %8 = tpu.matmul %5, %7, %cst {dimension_numbers = #tpu.dot_dimension_numbers<[1], [0], [0], [1], [0, 0, 1, 1], [], []>} : vector<128x4xbf16>, vector<4x24xbf16>, vector<128x24xf32> -> vector<128x24xf32>
    %9 = vector.extract_strided_slice %2 {offsets = [0, 1, 0], sizes = [8, 16, 4], strides = [1, 1, 1]} : vector<10x18x4xf32> to vector<8x16x4xf32>
    %10 = vector.shape_cast %9 : vector<8x16x4xf32> to vector<128x4xf32>
    %11 = arith.truncf %10 : vector<128x4xf32> to vector<128x4xbf16>
    %c1 = arith.constant 1 : index
    %c0_6 = arith.constant 0 : index
    %c0_7 = arith.constant 0 : index
    %12 = vector.load %arg2[%c1, %c0_6, %c0_7] : memref<9x4x24xbf16, #tpu.memory_space<vmem>>, vector<1x4x24xbf16>
    %13 = vector.shape_cast %12 : vector<1x4x24xbf16> to vector<4x24xbf16>
    %cst_8 = arith.constant dense<0.000000e+00> : vector<128x24xf32>
    %14 = tpu.matmul %11, %13, %cst_8 {dimension_numbers = #tpu.dot_dimension_numbers<[1], [0], [0], [1], [0, 0, 1, 1], [], []>} : vector<128x4xbf16>, vector<4x24xbf16>, vector<128x24xf32> -> vector<128x24xf32>
    %15 = arith.addf %8, %14 : vector<128x24xf32>
    %16 = vector.extract_strided_slice %2 {offsets = [0, 2, 0], sizes = [8, 16, 4], strides = [1, 1, 1]} : vector<10x18x4xf32> to vector<8x16x4xf32>
    %17 = vector.shape_cast %16 : vector<8x16x4xf32> to vector<128x4xf32>
    %18 = arith.truncf %17 : vector<128x4xf32> to vector<128x4xbf16>
    %c2 = arith.constant 2 : index
    %c0_9 = arith.constant 0 : index
    %c0_10 = arith.constant 0 : index
    %19 = vector.load %arg2[%c2, %c0_9, %c0_10] : memref<9x4x24xbf16, #tpu.memory_space<vmem>>, vector<1x4x24xbf16>
    %20 = vector.shape_cast %19 : vector<1x4x24xbf16> to vector<4x24xbf16>
    %cst_11 = arith.constant dense<0.000000e+00> : vector<128x24xf32>
    %21 = tpu.matmul %18, %20, %cst_11 {dimension_numbers = #tpu.dot_dimension_numbers<[1], [0], [0], [1], [0, 0, 1, 1], [], []>} : vector<128x4xbf16>, vector<4x24xbf16>, vector<128x24xf32> -> vector<128x24xf32>
    %22 = arith.addf %15, %21 : vector<128x24xf32>
    %23 = vector.extract_strided_slice %2 {offsets = [1, 0, 0], sizes = [8, 16, 4], strides = [1, 1, 1]} : vector<10x18x4xf32> to vector<8x16x4xf32>
    %24 = vector.shape_cast %23 : vector<8x16x4xf32> to vector<128x4xf32>
    %25 = arith.truncf %24 : vector<128x4xf32> to vector<128x4xbf16>
    %c3 = arith.constant 3 : index
    %c0_12 = arith.constant 0 : index
    %c0_13 = arith.constant 0 : index
    %26 = vector.load %arg2[%c3, %c0_12, %c0_13] : memref<9x4x24xbf16, #tpu.memory_space<vmem>>, vector<1x4x24xbf16>
    %27 = vector.shape_cast %26 : vector<1x4x24xbf16> to vector<4x24xbf16>
    %cst_14 = arith.constant dense<0.000000e+00> : vector<128x24xf32>
    %28 = tpu.matmul %25, %27, %cst_14 {dimension_numbers = #tpu.dot_dimension_numbers<[1], [0], [0], [1], [0, 0, 1, 1], [], []>} : vector<128x4xbf16>, vector<4x24xbf16>, vector<128x24xf32> -> vector<128x24xf32>
    %29 = arith.addf %22, %28 : vector<128x24xf32>
    %30 = vector.extract_strided_slice %2 {offsets = [1, 1, 0], sizes = [8, 16, 4], strides = [1, 1, 1]} : vector<10x18x4xf32> to vector<8x16x4xf32>
    %31 = vector.shape_cast %30 : vector<8x16x4xf32> to vector<128x4xf32>
    %32 = arith.truncf %31 : vector<128x4xf32> to vector<128x4xbf16>
    %c4 = arith.constant 4 : index
    %c0_15 = arith.constant 0 : index
    %c0_16 = arith.constant 0 : index
    %33 = vector.load %arg2[%c4, %c0_15, %c0_16] : memref<9x4x24xbf16, #tpu.memory_space<vmem>>, vector<1x4x24xbf16>
    %34 = vector.shape_cast %33 : vector<1x4x24xbf16> to vector<4x24xbf16>
    %cst_17 = arith.constant dense<0.000000e+00> : vector<128x24xf32>
    %35 = tpu.matmul %32, %34, %cst_17 {dimension_numbers = #tpu.dot_dimension_numbers<[1], [0], [0], [1], [0, 0, 1, 1], [], []>} : vector<128x4xbf16>, vector<4x24xbf16>, vector<128x24xf32> -> vector<128x24xf32>
    %36 = arith.addf %29, %35 : vector<128x24xf32>
    %37 = vector.extract_strided_slice %2 {offsets = [1, 2, 0], sizes = [8, 16, 4], strides = [1, 1, 1]} : vector<10x18x4xf32> to vector<8x16x4xf32>
    %38 = vector.shape_cast %37 : vector<8x16x4xf32> to vector<128x4xf32>
    %39 = arith.truncf %38 : vector<128x4xf32> to vector<128x4xbf16>
    %c5 = arith.constant 5 : index
    %c0_18 = arith.constant 0 : index
    %c0_19 = arith.constant 0 : index
    %40 = vector.load %arg2[%c5, %c0_18, %c0_19] : memref<9x4x24xbf16, #tpu.memory_space<vmem>>, vector<1x4x24xbf16>
    %41 = vector.shape_cast %40 : vector<1x4x24xbf16> to vector<4x24xbf16>
    %cst_20 = arith.constant dense<0.000000e+00> : vector<128x24xf32>
    %42 = tpu.matmul %39, %41, %cst_20 {dimension_numbers = #tpu.dot_dimension_numbers<[1], [0], [0], [1], [0, 0, 1, 1], [], []>} : vector<128x4xbf16>, vector<4x24xbf16>, vector<128x24xf32> -> vector<128x24xf32>
    %43 = arith.addf %36, %42 : vector<128x24xf32>
    %44 = vector.extract_strided_slice %2 {offsets = [2, 0, 0], sizes = [8, 16, 4], strides = [1, 1, 1]} : vector<10x18x4xf32> to vector<8x16x4xf32>
    %45 = vector.shape_cast %44 : vector<8x16x4xf32> to vector<128x4xf32>
    %46 = arith.truncf %45 : vector<128x4xf32> to vector<128x4xbf16>
    %c6 = arith.constant 6 : index
    %c0_21 = arith.constant 0 : index
    %c0_22 = arith.constant 0 : index
    %47 = vector.load %arg2[%c6, %c0_21, %c0_22] : memref<9x4x24xbf16, #tpu.memory_space<vmem>>, vector<1x4x24xbf16>
    %48 = vector.shape_cast %47 : vector<1x4x24xbf16> to vector<4x24xbf16>
    %cst_23 = arith.constant dense<0.000000e+00> : vector<128x24xf32>
    %49 = tpu.matmul %46, %48, %cst_23 {dimension_numbers = #tpu.dot_dimension_numbers<[1], [0], [0], [1], [0, 0, 1, 1], [], []>} : vector<128x4xbf16>, vector<4x24xbf16>, vector<128x24xf32> -> vector<128x24xf32>
    %50 = arith.addf %43, %49 : vector<128x24xf32>
    %51 = vector.extract_strided_slice %2 {offsets = [2, 1, 0], sizes = [8, 16, 4], strides = [1, 1, 1]} : vector<10x18x4xf32> to vector<8x16x4xf32>
    %52 = vector.shape_cast %51 : vector<8x16x4xf32> to vector<128x4xf32>
    %53 = arith.truncf %52 : vector<128x4xf32> to vector<128x4xbf16>
    %c7 = arith.constant 7 : index
    %c0_24 = arith.constant 0 : index
    %c0_25 = arith.constant 0 : index
    %54 = vector.load %arg2[%c7, %c0_24, %c0_25] : memref<9x4x24xbf16, #tpu.memory_space<vmem>>, vector<1x4x24xbf16>
    %55 = vector.shape_cast %54 : vector<1x4x24xbf16> to vector<4x24xbf16>
    %cst_26 = arith.constant dense<0.000000e+00> : vector<128x24xf32>
    %56 = tpu.matmul %53, %55, %cst_26 {dimension_numbers = #tpu.dot_dimension_numbers<[1], [0], [0], [1], [0, 0, 1, 1], [], []>} : vector<128x4xbf16>, vector<4x24xbf16>, vector<128x24xf32> -> vector<128x24xf32>
    %57 = arith.addf %50, %56 : vector<128x24xf32>
    %58 = vector.extract_strided_slice %2 {offsets = [2, 2, 0], sizes = [8, 16, 4], strides = [1, 1, 1]} : vector<10x18x4xf32> to vector<8x16x4xf32>
    %59 = vector.shape_cast %58 : vector<8x16x4xf32> to vector<128x4xf32>
    %60 = arith.truncf %59 : vector<128x4xf32> to vector<128x4xbf16>
    %c8 = arith.constant 8 : index
    %c0_27 = arith.constant 0 : index
    %c0_28 = arith.constant 0 : index
    %61 = vector.load %arg2[%c8, %c0_27, %c0_28] : memref<9x4x24xbf16, #tpu.memory_space<vmem>>, vector<1x4x24xbf16>
    %62 = vector.shape_cast %61 : vector<1x4x24xbf16> to vector<4x24xbf16>
    %cst_29 = arith.constant dense<0.000000e+00> : vector<128x24xf32>
    %63 = tpu.matmul %60, %62, %cst_29 {dimension_numbers = #tpu.dot_dimension_numbers<[1], [0], [0], [1], [0, 0, 1, 1], [], []>} : vector<128x4xbf16>, vector<4x24xbf16>, vector<128x24xf32> -> vector<128x24xf32>
    %64 = arith.addf %57, %63 : vector<128x24xf32>
    %cst_30 = arith.constant dense<0.000000e+00> : vector<24xf32>
    %65 = vector.multi_reduction <add>, %64, %cst_30 [0] : vector<128x24xf32> to vector<24xf32>
    %66 = vector.shape_cast %65 : vector<24xf32> to vector<1x24xf32>
    %67 = vector.shape_cast %66 : vector<1x24xf32> to vector<1x1x24xf32>
    %c0_31 = arith.constant 0 : index
    %c0_32 = arith.constant 0 : index
    %c0_33 = arith.constant 0 : index
    %68 = vector.load %arg3[%c0_31, %c0_32, %c0_33] : memref<1x1x24xf32, #tpu.memory_space<vmem>>, vector<1x1x24xf32>
    tpu.vector_store %arg3[%c0_31, %c0_32, %c0_33], %67 {strides = array<i32>} : memref<1x1x24xf32, #tpu.memory_space<vmem>>, vector<1x1x24xf32>,
    %69 = arith.mulf %64, %64 : vector<128x24xf32>
    %cst_34 = arith.constant dense<0.000000e+00> : vector<24xf32>
    %70 = vector.multi_reduction <add>, %69, %cst_34 [0] : vector<128x24xf32> to vector<24xf32>
    %71 = vector.shape_cast %70 : vector<24xf32> to vector<1x24xf32>
    %72 = vector.shape_cast %71 : vector<1x24xf32> to vector<1x1x24xf32>
    %c0_35 = arith.constant 0 : index
    %c0_36 = arith.constant 0 : index
    %c0_37 = arith.constant 0 : index
    %73 = vector.load %arg4[%c0_35, %c0_36, %c0_37] : memref<1x1x24xf32, #tpu.memory_space<vmem>>, vector<1x1x24xf32>
    tpu.vector_store %arg4[%c0_35, %c0_36, %c0_37], %72 {strides = array<i32>} : memref<1x1x24xf32, #tpu.memory_space<vmem>>, vector<1x1x24xf32>,
    return
  }
  func.func @transform_0(%arg0: i32) -> (i32, i32, i32, i32) {
    %c0_i32 = arith.constant 0 : i32
    %c0_i32_0 = arith.constant 0 : i32
    %c0_i32_1 = arith.constant 0 : i32
    %c0_i32_2 = arith.constant 0 : i32
    return %arg0, %c0_i32, %c0_i32_0, %c0_i32_1 : i32, i32, i32, i32
  }
  func.func @transform_1(%arg0: i32) -> (i32, i32, i32) {
    %c0_i32 = arith.constant 0 : i32
    %c0_i32_0 = arith.constant 0 : i32
    %c0_i32_1 = arith.constant 0 : i32
    %c0_i32_2 = arith.constant 0 : i32
    return %c0_i32, %c0_i32_0, %c0_i32_1 : i32, i32, i32
  }
  func.func @transform_2(%arg0: i32) -> (i32, i32, i32) {
    %c0_i32 = arith.constant 0 : i32
    %c0_i32_0 = arith.constant 0 : i32
    %c0_i32_1 = arith.constant 0 : i32
    return %arg0, %c0_i32, %c0_i32_0 : i32, i32, i32
  }
  func.func @transform_3(%arg0: i32) -> (i32, i32, i32) {
    %c0_i32 = arith.constant 0 : i32
    %c0_i32_0 = arith.constant 0 : i32
    %c0_i32_1 = arith.constant 0 : i32
    return %arg0, %c0_i32, %c0_i32_0 : i32, i32, i32
  }
}

</mosaic_0001>

<bundles_post_ra>
// kernel: tpu_custom_call.1
= control target key start
LH: loop header
LB: loop body
LE: loop exit
PB: predicated region body
PF: predicated region fallthrough
CT: control target
= control target key end

     0   :  { %9 = vsyncpa [#allocation3], 0  ;;  %s3018_s0 = inlined_call_operand.vmem [shape: bf16[4,10,18,4], index: 0, kind: input, shape index: {}]   ;;  %s3019_s1 = inlined_call_operand.vmem [shape: bf16[9,4,24], index: 1, kind: input, shape index: {}]   ;;  %s3020_s2 = inlined_call_operand.hbm [shape: f32[4,1,24], index: 2, kind: output, shape index: {0}]   ;;  %s3021_s3 = inlined_call_operand.hbm [shape: f32[4,1,24], index: 3, kind: output, shape index: {1}]  }
   0x1   :  { %11 = vsyncpa [#allocation3 + $0x1], 0 }
   0x2   :  { %12 = vsyncpa [#allocation5], 0 }
   0x3   :  { %14 = vsyncpa [#allocation5 + $0x1], 0  ;;  %s2434_s12 = smov 0   ;;  %s2436_s13 = smov 0  }
   0x4   :  { %s2438_s14 = smov 0   ;;  %s2440_s15 = smov 0  }
   0x5 LB: > { %s2455_s16 = sadd.s32 4294967295, %s2410_s15   ;;  %s1769_s17 = sadd.s32 4294967294, %s2410_s15   ;;  %s2410_s15 = sphi %s2440_s15, %s3027_s15   ;;  %s2406_s14 = sphi %s2438_s14, %s3026_s14   ;;  %s2402_s13 = sphi %s2436_s13, %s3025_s13   ;;  %s2398_s12 = sphi %s2434_s12, %s3024_s12  }
   0x6   : > { %s2459_s18 = sadd.s32 1, %s2410_s15   ;;  %s74_s19 = sadd.s32 1, %s2406_s14 }
   0x7   : > { %s71_s20 = ssub.s32 %s2410_s15, %s2459_s18  ;;  %p84_p0 = scmp.ne.s32.totalorder %s2406_s14, %s2402_s13 }
   0x8   : > { %p72_p1 = scmp.eq.s32.totalorder %s71_s20, 0  ;;  %p85_p2 = scmp.eq.s32.totalorder %s2455_s16, 3 }
   0x9   : > { %p90_p3 = scmp.ne.s32.totalorder %s2402_s13, %s2398_s12  ;;  %p91_p4 = scmp.eq.s32.totalorder %s1769_s17, 3 }
   0xa   : > { %s2470_s21 = scalar_select %p72_p1, %s2406_s14, %s74_s19  }
   0xb   : > { %p2472_p5 = por %p85_p2, %p84_p0  ;;  %p2476_p6 = por %p91_p4, %p90_p3 }
   0xc   : > { %p1772_p7 = scmp.ge.s32.totalorder %s2410_s15, 1  ;;  %p146_p8 = scmp.lt.s32.totalorder %s2410_s15, 5 }
   0xe   : > { %p147_p9 = pnand %p1772_p7, %p146_p8 }
   0xf   : > { %v1782_v0 = vld [vmem:[%s3019_s1 + $0x2] sm:$0x3] (!%p147_p9)  ;;  %vm364_vm0 = vcmask (!%p147_p9), 1041408   ;;  %v2488_v1 = vld [vmem:[%s3019_s1 + $0x8] sm:$0x3] (!%p147_p9)  ;;  %p173_p10 = scmp.lt.s32.totalorder (!%p147_p9), %s2455_s16, 3 }
  0x10   : > { %150 = sbr.rel (%p147_p9) target bundleno = 450 (0x1c2), region = 28  ;;  %2241 = vmatprep.subr.msk.bf16.mxu1 (!%p147_p9), %vm364_vm0, %v1782_v0  ;;  %2245 = vmatprep.subr.msk.bf16.mxu0 (!%p147_p9), %vm364_vm0, %v2488_v1  ;;  %v366_v2 = vsel (!%p147_p9), %vm364_vm0, %v1782_v0, 0  ;;  %v2497_v3 = vsel (!%p147_p9), %vm364_vm0, %v2488_v1, 0  ;;  %v247_v4 = vld [vmem:[%s3019_s1] sm:$0x3] (!%p147_p9)  ;;  %vm272_vm1 = vcmask (!%p147_p9), 1046528  }
  0x11   : > { %1950 = vmatpush3.bf16.msra.mxu1 (!%p147_p9), %v366_v2  ;;  %2022 = vmatpush3.bf16.msra.mxu0 (!%p147_p9), %v2497_v3  ;;  %v1827_v5 = vld [vmem:[%s3019_s1 + $0xa] sm:$0x3] (!%p147_p9)  ;;  %vm339_vm2 = vcmask (!%p147_p9), 31744   ;;  %v490_v27 = vsel (!%p147_p9), %vm364_vm0, %v247_v4, 0  ;;  %vm589_vm3 = vcmask (!%p147_p9), 1045504   ;;  %vm1562_vm4 = vcmask (!%p147_p9), 195584  }
  0x12   : > { %2242 = vmatprep.subr.msk.bf16.mxu1 (!%p147_p9), %vm364_vm0, %v247_v4  ;;  %2247 = vmatprep.subr.msk.bf16.mxu0 (!%p147_p9), %vm364_vm0, %v1827_v5  ;;  %v1064_v31 = vsel (!%p147_p9), %vm364_vm0, %v1827_v5, 0  ;;  %v2568_v47 = vld [vmem:[%s3019_s1 + $0x4] sm:$0x3] (!%p147_p9)  ;;  %v2601_v4 = vld [vmem:[%s3019_s1 + $0xc] sm:$0x3] (!%p147_p9)  ;;  %s2932_s29 = sand.u32 (!%p147_p9), 1, %s2402_s13  }
  0x13   : > { %s166_s4 = scalar_lea.vmem (!%p147_p9), [#allocation2], %s2932_s29  ;;  %vm1600_vm5 = vcmask (!%p147_p9), 188416   ;;  %s1657_s19 = scalar_lea.sflag (!%p147_p9), [#allocation3], %s2932_s29 }
  0x14   : > { %s1673_s5 = sshll.u32 (!%p147_p9), %s166_s4, 4  ;;  %s2412_s24 = smov (!%p147_p9), [#allocation2]   ;;  %s2944_s5 = int_to_ptr.vmem [resolvable:$true] %s1673_s5 }
  0x15   : > { %s2316_s20 = scalar_lea.vmem (!%p147_p9), %s2944_s5, 16  ;;  %s2320_s25 = sshll.u32 (!%p147_p9), %s2412_s24, 4  ;;  %s2321_s25 = int_to_ptr.vmem [resolvable:$false] %s2320_s25 }
  0x16   : > { %p2317_p11 = scmp.ne.s32.totalorder (!%p147_p9), %s2944_s5, %s2316_s20  ;;  %s2322_s26 = scalar_lea.vmem (!%p147_p9), %s2321_s25, 32 }
  0x17   : > { %s174_s30 = scalar_select %p173_p10, %s2455_s16, 3 }
  0x18   : > { %p2318_p12 = pnand %p2317_p11, %p2472_p5  ;;  %p2323_p0 = scmp.lt.s32.totalorder %s2944_s5, %s2321_s25 }
  0x19   : > { %s2251_s6 = smul.u32 120, %s174_s30  ;;  %s1864_s30 = sshll.u32 %s2455_s16, 4 }
  0x1a   : > { %s2942_s10 = scalar_lea.hbm %s3020_s2, %s1864_s30  ;;  %s2950_s17 = scalar_lea.hbm %s3021_s3, %s1864_s30 }
  0x1b   : > { %s2512_s9 = scalar_lea.vmem %s3018_s0, %s2251_s6  ;;  %s172_s6 = scalar_lea.vmem [#allocation4], %s2932_s29 }
  0x1c   : > { %v2515_v6 = vld [vmem:[%s2512_s9] sm:$0xff]   ;;  %v2518_v7 = vld [vmem:[%s2512_s9 + $0x8] sm:$0x1]  ;;  %v2521_v8 = vld [vmem:[%s2512_s9 + $0xc] sm:$0xff]   ;;  %s1686_s7 = sshll.u32 %s172_s6, 4  ;;  %p2319_p13 = pneg %p2318_p12  ;;  %s2952_s7 = int_to_ptr.vmem [resolvable:$true] %s1686_s7 }
  0x1d   : > { %v209_v9 = vunpack.c.l.bf16 %v2515_v6  ;;  %v210_v10 = vunpack.c.h.bf16 %v2515_v6  ;;  %v211_v11 = vunpack.c.l.bf16 %v2518_v7  ;;  %v184_v12 = vld [vmem:[%s2512_s9 + $0x14] sm:$0x1]  ;;  %v212_v13 = vunpack.c.l.bf16 %v2521_v8  ;;  %v2529_v14 = vld [vmem:[%s2512_s9 + $0x18] sm:$0xff]   ;;  %v2540_v23 = vld [vmem:[%s2512_s9 + $0x20] sm:$0x1]  ;;  %p2324_p1 = scmp.lt.s32.totalorder %s2322_s26, %s2316_s20 }
  0x1e   : > { %v213_v15 = vunpack.c.h.bf16 %v2521_v8  ;;  %v214_v16 = vunpack.c.l.bf16 %v184_v12  ;;  %v215_v20 = vunpack.c.l.bf16 %v2529_v14  ;;  %v2546_v28 = vld [vmem:[%s2512_s9 + $0x24] sm:$0xff]   ;;  %v216_v33 = vunpack.c.h.bf16 %v2529_v14  ;;  %v2554_v36 = vld [vmem:[%s2512_s9 + $0x2c] sm:$0x1]  ;;  %v2557_v37 = vld [vmem:[%s2512_s9 + $0x30] sm:$0xff]  }
  0x1f   : > { %v273_v17 = vrot.slane %v209_v9, 1  ;;  %v274_v18 = vrot.slane %v210_v10, 1  ;;  %v276_v19 = vrot.slane %v211_v11, 1  ;;  %v278_v21 = vrot.slane %v212_v13, 1  ;;  %v2563_v42 = vld [vmem:[%s2512_s9 + $0x38] sm:$0x1]  ;;  %p2325_p2 = por %p2324_p1, %p2323_p0 }
  0x20   : > { %v279_v22 = vrot.slane %v213_v15, 1  ;;  %v281_v26 = vrot.slane %v214_v16, 1  ;;  %v217_v34 = vunpack.c.l.bf16 %v2540_v23  ;;  %v283_v35 = vrot.slane %v215_v20, 1  ;;  %v2581_v56 = vld [vmem:[%s2512_s9 + $0x3c] sm:$0xff]   ;;  %v2589_v61 = vld [vmem:[%s2512_s9 + $0x44] sm:$0x1] }
  0x21   : > { %v275_v24 = vsel %vm272_vm1, %v273_v17, %v274_v18  ;;  %v277_v25 = vsel %vm272_vm1, %v274_v18, %v276_v19  ;;  %v595_v39 = vrot.slane %v212_v13, 2  ;;  %v218_v40 = vunpack.c.l.bf16 %v2546_v28  ;;  %p2326_p3 = pnand %p2325_p2, %p2319_p13 }
  0x22   : > { %v329_v29 = vpack.c.bf16 %v277_v25, %v275_v24  ;;  %v280_v30 = vsel %vm272_vm1, %v278_v21, %v279_v22  ;;  %v282_v32 = vsel %vm272_vm1, %v279_v22, %v281_v26  ;;  %v219_v41 = vunpack.c.h.bf16 %v2546_v28  ;;  %v2620_v21 = vld [vmem:[%s2512_s9 + $0x50] sm:$0x1] }
  0x23   : > { %v330_v38 = vpack.c.bf16 %v282_v32, %v280_v30  ;;  %v596_v43 = vrot.slane %v213_v15, 2  ;;  %v598_v44 = vrot.slane %v214_v16, 2  ;;  %v284_v45 = vrot.slane %v216_v33, 1  ;;  %v2612_v16 = vld [vmem:[%s2512_s9 + $0x48] sm:$0xff]  }
  0x24   : > { %1951 = vmatprep.mubr.msk.bf16.mxu1 %vm339_vm2, %v329_v29  ;;  %v286_v46 = vrot.slane %v217_v34, 1  ;;  %v220_v48 = vunpack.c.l.bf16 %v2554_v36  ;;  %v288_v49 = vrot.slane %v218_v40, 1  ;;  %v289_v50 = vrot.slane %v219_v41, 1  ;;  %v202_v36 = vld [vmem:[%s2512_s9 + $0x5c] sm:$0x1] }
  0x25   : > { %2023 = vmatprep.mubr.msk.bf16.mxu0 %vm339_vm2, %v330_v38  ;;  %1952 = vmatmul.mubr.msk.bf16.vlgmr.msra.gmra.mrb[0].mxu1 %vm339_vm2, %v330_v38  ;;  %v221_v51 = vunpack.c.l.bf16 %v2557_v37  ;;  %v285_v52 = vsel %vm272_vm1, %v283_v35, %v284_v45  ;;  %v222_v54 = vunpack.c.h.bf16 %v2557_v37  ;;  %v223_v55 = vunpack.c.l.bf16 %v2563_v42 }
  0x26   : > { %1968 = vmatpush3.bf16.msra.mxu1 %v490_v27  ;;  %v287_v53 = vsel %vm272_vm1, %v284_v45, %v286_v46  ;;  %v290_v58 = vsel %vm272_vm1, %v288_v49, %v289_v50  ;;  %v291_v59 = vrot.slane %v220_v48, 1  ;;  %v600_v62 = vrot.slane %v215_v20, 2 }
  0x27   : > { %v2583_v57 = vpack.c.bf16 %v287_v53, %v285_v52  ;;  %v293_v60 = vrot.slane %v221_v51, 1  ;;  %2243 = vmatprep.subr.msk.bf16.mxu1 %vm364_vm0, %v2568_v47  ;;  %v294_v63 = vrot.slane %v222_v54, 1  ;;  %v296_v0 = vrot.slane %v223_v55, 1 }
  0x28   : > { %v597_v2 = vsel %vm589_vm3, %v595_v39, %v596_v43  ;;  %v292_v5 = vsel %vm272_vm1, %v289_v50, %v291_v59  ;;  %v599_v12 = vsel %vm589_vm3, %v596_v43, %v598_v44  ;;  %v224_v13 = vunpack.c.l.bf16 %v2581_v56 }
  0x29   : > { %2024 = vmatmul.mubr.msk.bf16.vlgmr.msra.gmra.mrb[0].mxu0 %vm339_vm2, %v2583_v57  ;;  %1955 = vmatprep.mubr.msk.bf16.mxu1 %vm339_vm2, %v2583_v57  ;;  %v225_v15 = vunpack.c.h.bf16 %v2581_v56  ;;  %v2614_v17 = vpack.c.bf16 %v292_v5, %v290_v58  ;;  %v295_v18 = vsel %vm272_vm1, %v293_v60, %v294_v63  ;;  %v297_v19 = vsel %vm272_vm1, %v294_v63, %v296_v0 }
  0x2a   : > { %2040 = vmatpush3.bf16.msra.mxu0 %v1064_v31  ;;  %v226_v20 = vunpack.c.l.bf16 %v2589_v61  ;;  %v601_v22 = vrot.slane %v216_v33, 2  ;;  %v603_v23 = vrot.slane %v217_v34, 2  ;;  %v298_v24 = vrot.slane %v224_v13, 1  ;;  %v2631_v31 = vld [vmem:[%s2512_s9 + $0x54] sm:$0xff]  }
  0x2b   : > { %2248 = vmatprep.subr.msk.bf16.mxu0 %vm364_vm0, %v2601_v4  ;;  %v299_v25 = vrot.slane %v225_v15, 1  ;;  %2027 = vmatprep.mubr.msk.bf16.mxu0 %vm339_vm2, %v2614_v17  ;;  %v2626_v26 = vpack.c.bf16 %v297_v19, %v295_v18  ;;  %v227_v29 = vunpack.c.l.bf16 %v2612_v16  ;;  %v228_v30 = vunpack.c.h.bf16 %v2612_v16 }
  0x2c   : > { %v301_v27 = vrot.slane %v226_v20, 1  ;;  %v2635_v32 = vpack.c.bf16 %v599_v12, %v597_v2  ;;  %v229_v34 = vunpack.c.l.bf16 %v2620_v21  ;;  %v605_v35 = vrot.slane %v218_v40, 2 }
  0x2d   : > { %1956 = vmatmul.mubr.msk.bf16.gmra.mrb[4].mxu1 %vm339_vm2, %v2614_v17  ;;  %v300_v33 = vsel %vm272_vm1, %v298_v24, %v299_v25  ;;  %v303_v39 = vrot.slane %v227_v29, 1  ;;  %v304_v43 = vrot.slane %v228_v30, 1  ;;  %v606_v44 = vrot.slane %v219_v41, 2 }
  0x2e   : > { %1959 = vmatprep.mubr.msk.bf16.mxu1 %vm339_vm2, %v2626_v26  ;;  %v302_v38 = vsel %vm272_vm1, %v299_v25, %v301_v27  ;;  %v602_v45 = vsel %vm589_vm3, %v600_v62, %v601_v22  ;;  %v306_v46 = vrot.slane %v229_v34, 1  ;;  %v608_v49 = vrot.slane %v220_v48, 2 }
  0x2f   : > { %v230_v50 = vunpack.c.l.bf16 %v2631_v31  ;;  %v604_v52 = vsel %vm589_vm3, %v601_v22, %v603_v23  ;;  %v305_v40 = vsel %vm272_vm1, %v303_v39, %v304_v43  ;;  %v231_v53 = vunpack.c.h.bf16 %v2631_v31  ;;  %v2703_v39 = vld [vmem:[%s2512_s9 + $0x60] sm:$0xff]  }
  0x30   : > { %v232_v58 = vunpack.c.l.bf16 %v202_v36  ;;  %v2652_v59 = vpack.c.bf16 %v302_v38, %v300_v33  ;;  %v307_v41 = vsel %vm272_vm1, %v304_v43, %v306_v46  ;;  %v607_v60 = vsel %vm589_vm3, %v605_v35, %v606_v44  ;;  %v2706_v43 = vld [vmem:[%s2512_s9 + $0x6c] sm:$0xff]   ;;  %v208_v46 = vld [vmem:[%s2512_s9 + $0x74] sm:$0x1] }
  0x31   : > { %2028 = vmatmul.mubr.msk.bf16.gmra.mrb[4].mxu0 %vm339_vm2, %v2626_v26  ;;  %v609_v48 = vsel %vm589_vm3, %v606_v44, %v608_v49  ;;  %v2659_v61 = vpack.c.bf16 %v307_v41, %v305_v40  ;;  %v308_v62 = vrot.slane %v230_v50, 1  ;;  %v309_v63 = vrot.slane %v231_v53, 1 }
  0x32   : > { %2041 = vmatprep.mubr.msk.bf16.mxu0 %vm339_vm2, %v2635_v32  ;;  %v311_v0 = vrot.slane %v232_v58, 1  ;;  %v2661_v2 = vpack.c.bf16 %v604_v52, %v602_v45  ;;  %v610_v5 = vrot.slane %v221_v51, 2  ;;  %v2667_v12 = vpack.c.bf16 %v609_v48, %v607_v60 }
  0x33   : > { %v611_v18 = vrot.slane %v222_v54, 2  ;;  %v613_v19 = vrot.slane %v223_v55, 2  ;;  %v615_v21 = vrot.slane %v224_v13, 2  ;;  %v310_v22 = vsel %vm272_vm1, %v308_v62, %v309_v63  ;;  %v2682_v54 = vld [vmem:[%s3019_s1 + $0xe] sm:$0x3] }
  0x34   : > { %v312_v23 = vsel %vm272_vm1, %v309_v63, %v311_v0  ;;  %v616_v51 = vrot.slane %v225_v15, 2  ;;  %v618_v24 = vrot.slane %v226_v20, 2  ;;  %v1186_v25 = vsel %vm364_vm0, %v2601_v4, 0 }
  0x35   : > { %1960 = vmatmul.mubr.msk.bf16.gmra.mrb[8].mxu1 %vm339_vm2, %v2652_v59  ;;  %v2686_v42 = vpack.c.bf16 %v312_v23, %v310_v22  ;;  %v612_v55 = vsel %vm589_vm3, %v610_v5, %v611_v18  ;;  %v614_v4 = vsel %vm589_vm3, %v611_v18, %v613_v19  ;;  %v620_v20 = vrot.slane %v227_v29, 2 }
  0x36   : > { %1963 = vmatprep.mubr.msk.bf16.mxu1 %vm339_vm2, %v2659_v61  ;;  %v617_v13 = vsel %vm589_vm3, %v615_v21, %v616_v51  ;;  %v619_v15 = vsel %vm589_vm3, %v616_v51, %v618_v24  ;;  %v621_v27 = vrot.slane %v228_v30, 2  ;;  %v623_v33 = vrot.slane %v229_v34, 2  ;;  %v2711_v34 = vld [vmem:[%s2512_s9 + $0x68] sm:$0x1]  ;;  %v1809_v51 = vld [vmem:[%s3019_s1 + $0x6] sm:$0x3] }
  0x37   : > { %v2698_v35 = vpack.c.bf16 %v614_v4, %v612_v55  ;;  %v2700_v36 = vpack.c.bf16 %v619_v15, %v617_v13  ;;  %v625_v38 = vrot.slane %v230_v50, 2  ;;  %v626_v29 = vrot.slane %v231_v53, 2 }
  0x38   : > { %v628_v30 = vrot.slane %v232_v58, 2  ;;  %v236_v44 = vunpack.c.l.bf16 %v2706_v43  ;;  %v237_v45 = vunpack.c.h.bf16 %v2706_v43  ;;  %v622_v49 = vsel %vm589_vm3, %v620_v20, %v621_v27 }
  0x39   : > { %2042 = vmatmul.mubr.msk.bf16.vlgmr.msra.gmra.mrb[0].mxu0 %vm339_vm2, %v2661_v2  ;;  %v624_v50 = vsel %vm589_vm3, %v621_v27, %v623_v33  ;;  %v233_v53 = vunpack.c.l.bf16 %v2703_v39  ;;  %v234_v58 = vunpack.c.h.bf16 %v2703_v39  ;;  %v235_v48 = vunpack.c.l.bf16 %v2711_v34 }
  0x3a   : > { %2058 = vmatpush3.bf16.msra.mxu0 %v1186_v25  ;;  %2045 = vmatprep.mubr.msk.bf16.mxu0 %vm339_vm2, %v2667_v12  ;;  %v1304_v52 = vrot.slane %v236_v44, 1  ;;  %v1305_v40 = vrot.slane %v237_v45, 1  ;;  %v1433_v41 = vrot.slane %v236_v44, 2  ;;  %v1434_v60 = vrot.slane %v237_v45, 2 }
  0x3b   : > { %2249 = vmatprep.subr.msk.bf16.mxu0 %vm364_vm0, %v2682_v54  ;;  %v238_v62 = vunpack.c.l.bf16 %v208_v46  ;;  %v627_v63 = vsel %vm589_vm3, %v625_v38, %v626_v29  ;;  %v629_v0 = vsel %vm589_vm3, %v626_v29, %v628_v30  ;;  %v681_v19 = vsel %vm364_vm0, %v2568_v47, 0 }
  0x3c   : > { %v2728_v5 = vsel %vm272_vm1, %v1304_v52, %v1305_v40  ;;  %v2731_v18 = vsel %vm589_vm3, %v1433_v41, %v1434_v60  ;;  %v2735_v23 = vpack.c.bf16 %v624_v50, %v622_v49  ;;  %v2742_v24 = vpack.c.bf16 %v629_v0, %v627_v63 }
  0x3d   : > { %1964 = vmatmul.mubr.msk.bf16.gmra.mrb[12].mxu1 %vm339_vm2, %v2686_v42  ;;  %v1307_v21 = vrot.slane %v238_v62, 1  ;;  %v1436_v22 = vrot.slane %v238_v62, 2  ;;  %v1050_v25 = vrot.slane %v233_v53, 2  ;;  %v1051_v4 = vrot.slane %v234_v58, 2 }
  0x3e   : > { %1969 = vmatprep.mubr.msk.bf16.mxu1 %vm339_vm2, %v2515_v6  ;;  %v1053_v13 = vrot.slane %v235_v48, 2  ;;  %v590_v29 = vrot.slane %v209_v9, 2  ;;  %v591_v30 = vrot.slane %v210_v10, 2  ;;  %v593_v44 = vrot.slane %v211_v11, 2  ;;  %v1855_v6 = vld [vmem:[%s3019_s1 + $0x10] sm:$0x3] }
  0x3f   : > { %v2747_v55 = vsel %vm272_vm1, %v1305_v40, %v1307_v21  ;;  %v2750_v47 = vsel %vm589_vm3, %v1434_v60, %v1436_v22  ;;  %v1052_v27 = vsel %vm589_vm3, %v1050_v25, %v1051_v4  ;;  %v1318_v45 = vsel %vm364_vm0, %v2682_v54, 0 }
  0x40   : > { %v1311_v15 = vpack.c.bf16 %v2747_v55, %v2728_v5  ;;  %v1440_v20 = vpack.c.bf16 %v2750_v47, %v2731_v18  ;;  %v1054_v33 = vsel %vm589_vm3, %v1051_v4, %v1053_v13  ;;  %v592_v46 = vsel %vm589_vm3, %v590_v29, %v591_v30 }
  0x41   : > { %2046 = vmatmul.mubr.msk.bf16.gmra.mrb[4].mxu0 %vm339_vm2, %v2698_v35  ;;  %v2771_v38 = vpack.c.bf16 %v1054_v33, %v1052_v27  ;;  %v594_v49 = vsel %vm589_vm3, %v591_v30, %v593_v44  ;;  %v803_v9 = vsel %vm364_vm0, %v1809_v51, 0  ;;  %v921_v10 = vrot.slane %v233_v53, 1 }
  0x42   : > { %2049 = vmatprep.mubr.msk.bf16.mxu0 %vm339_vm2, %v2700_v36  ;;  %v646_v7 = vpack.c.bf16 %v594_v49, %v592_v46  ;;  %v922_v11 = vrot.slane %v234_v58, 1 }
  0x45   : > { %1970 = vmatmul.mubr.msk.bf16.vlgmr.msra.gmra.mrb[0].mxu1 %vm339_vm2, %v2521_v8 }
  0x46   : > { %1986 = vmatpush3.bf16.msra.mxu1 %v681_v19  ;;  %1973 = vmatprep.mubr.msk.bf16.mxu1 %vm339_vm2, %v2529_v14 }
  0x47   : > { %2244 = vmatprep.subr.msk.bf16.mxu1 %vm364_vm0, %v1809_v51 }
  0x49   : > { %2050 = vmatmul.mubr.msk.bf16.gmra.mrb[8].mxu0 %vm339_vm2, %v2735_v23 }
  0x4a   : > { %2053 = vmatprep.mubr.msk.bf16.mxu0 %vm339_vm2, %v2742_v24 }
  0x4d   : > { %1974 = vmatmul.mubr.msk.bf16.gmra.mrb[4].mxu1 %vm339_vm2, %v2546_v28 }
  0x4e   : > { %1977 = vmatprep.mubr.msk.bf16.mxu1 %vm339_vm2, %v2557_v37 }
  0x51   : > { %2054 = vmatmul.mubr.msk.bf16.gmra.mrb[12].mxu0 %vm339_vm2, %v2771_v38 }
  0x52   : > { %2059 = vmatprep.mubr.msk.bf16.mxu0 %vm339_vm2, %v2529_v14 }
  0x55   : > { %1978 = vmatmul.mubr.msk.bf16.gmra.mrb[8].mxu1 %vm339_vm2, %v2581_v56 }
  0x56   : > { %1981 = vmatprep.mubr.msk.bf16.mxu1 %vm339_vm2, %v2612_v16 }
  0x59   : > { %2060 = vmatmul.mubr.msk.bf16.vlgmr.msra.gmra.mrb[0].mxu0 %vm339_vm2, %v2546_v28 }
  0x5a   : > { %2076 = vmatpush3.bf16.msra.mxu0 %v1318_v45  ;;  %2063 = vmatprep.mubr.msk.bf16.mxu0 %vm339_vm2, %v2557_v37 }
  0x5b   : > { %2250 = vmatprep.subr.msk.bf16.mxu0 %vm364_vm0, %v1855_v6 }
  0x5d   : > { %1982 = vmatmul.mubr.msk.bf16.gmra.mrb[12].mxu1 %vm339_vm2, %v2631_v31 }
  0x5e   : > { %1987 = vmatprep.mubr.msk.bf16.mxu1 %vm339_vm2, %v646_v7 }
  0x61   : > { %2064 = vmatmul.mubr.msk.bf16.gmra.mrb[4].mxu0 %vm339_vm2, %v2581_v56 }
  0x62   : > { %2067 = vmatprep.mubr.msk.bf16.mxu0 %vm339_vm2, %v2612_v16 }
  0x65   : > { %1988 = vmatmul.mubr.msk.bf16.vlgmr.msra.gmra.mrb[0].mxu1 %vm339_vm2, %v2635_v32 }
  0x66   : > { %2004 = vmatpush3.bf16.msra.mxu1 %v803_v9  ;;  %1991 = vmatprep.mubr.msk.bf16.mxu1 %vm339_vm2, %v2661_v2 }
  0x67   : > { %2246 = vmatprep.subr.msk.bf16.mxu1 %vm364_vm0, %v2488_v1  ;;  %v1447_v1 = vsel %vm364_vm0, %v1855_v6, 0 }
  0x69   : > { %2068 = vmatmul.mubr.msk.bf16.gmra.mrb[8].mxu0 %vm339_vm2, %v2631_v31 }
  0x6a   : > { %2071 = vmatprep.mubr.msk.bf16.mxu0 %vm339_vm2, %v2703_v39 }
  0x6d   : > { %1992 = vmatmul.mubr.msk.bf16.gmra.mrb[4].mxu1 %vm339_vm2, %v2667_v12 }
  0x6e   : > { %1995 = vmatprep.mubr.msk.bf16.mxu1 %vm339_vm2, %v2698_v35 }
  0x71   : > { %2072 = vmatmul.mubr.msk.bf16.gmra.mrb[12].mxu0 %vm339_vm2, %v2706_v43 }
  0x72   : > { %2077 = vmatprep.mubr.msk.bf16.mxu0 %vm339_vm2, %v2583_v57  ;;  %v924_v57 = vrot.slane %v235_v48, 1 }
  0x75   : > { %1996 = vmatmul.mubr.msk.bf16.gmra.mrb[8].mxu1 %vm339_vm2, %v2700_v36 }
  0x76   : > { %1999 = vmatprep.mubr.msk.bf16.mxu1 %vm339_vm2, %v2735_v23 }
  0x79   : > { %2078 = vmatmul.mubr.msk.bf16.vlgmr.msra.gmra.mrb[0].mxu0 %vm339_vm2, %v2614_v17  ;;  %v923_v17 = vsel %vm272_vm1, %v921_v10, %v922_v11 }
  0x7a   : > { %2094 = vmatpush3.bf16.msra.mxu0 %v1447_v1  ;;  %2081 = vmatprep.mubr.msk.bf16.mxu0 %vm339_vm2, %v2626_v26  ;;  %v925_v26 = vsel %vm272_vm1, %v922_v11, %v924_v57 }
  0x7d   : > { %2000 = vmatmul.mubr.msk.bf16.gmra.mrb[12].mxu1 %vm339_vm2, %v2742_v24 }
  0x7e   : > { %2005 = vmatprep.mubr.msk.bf16.mxu1 %vm339_vm2, %v2521_v8  ;;  %v928_v8 = vpack.c.bf16 %v925_v26, %v923_v17 }
  0x81   : > { %2082 = vmatmul.mubr.msk.bf16.gmra.mrb[4].mxu0 %vm339_vm2, %v2652_v59 }
  0x82   : > { %2085 = vmatprep.mubr.msk.bf16.mxu0 %vm339_vm2, %v2659_v61 }
  0x85   : > { %2006 = vmatmul.mubr.msk.bf16.vlgmr.msra.gmra.mrb[0].mxu1 %vm339_vm2, %v2529_v14 }
  0x86   : > { %2112 = vmatpush3.bf16.msra.mxu1 %v2497_v3  ;;  %2009 = vmatprep.mubr.msk.bf16.mxu1 %vm339_vm2, %v2546_v28 }
  0x89   : > { %2086 = vmatmul.mubr.msk.bf16.gmra.mrb[8].mxu0 %vm339_vm2, %v2686_v42 }
  0x8a   : > { %2089 = vmatprep.mubr.msk.bf16.mxu0 %vm339_vm2, %v928_v8 }
  0x8d   : > { %2010 = vmatmul.mubr.msk.bf16.gmra.mrb[4].mxu1 %vm339_vm2, %v2557_v37 }
  0x8e   : > { %2013 = vmatprep.mubr.msk.bf16.mxu1 %vm339_vm2, %v2581_v56 }
  0x91   : > { %2090 = vmatmul.mubr.msk.bf16.gmra.mrb[12].mxu0 %vm339_vm2, %v1311_v15 }
  0x92   : > { %2095 = vmatprep.mubr.msk.bf16.mxu0 %vm339_vm2, %v2661_v2 }
  0x95   : > { %2014 = vmatmul.mubr.msk.bf16.gmra.mrb[8].mxu1 %vm339_vm2, %v2612_v16 }
  0x96   : > { %2017 = vmatprep.mubr.msk.bf16.mxu1 %vm339_vm2, %v2631_v31 }
  0x99   : > { %2096 = vmatmul.mubr.msk.bf16.vlgmr.msra.gmra.mrb[0].mxu0 %vm339_vm2, %v2667_v12 }
  0x9a   : > { %2099 = vmatprep.mubr.msk.bf16.mxu0 %vm339_vm2, %v2698_v35 }
  0x9d   : > { %2018 = vmatmul.mubr.msk.bf16.gmra.mrb[12].mxu1 %vm339_vm2, %v2703_v39 }
  0x9e   : > { %2031 = vmatprep.mubr.msk.bf16.mxu1 %vm339_vm2, %v2652_v59 }
  0xa1   : > { %2100 = vmatmul.mubr.msk.bf16.gmra.mrb[4].mxu0 %vm339_vm2, %v2700_v36 }
  0xa2   : > { %2103 = vmatprep.mubr.msk.bf16.mxu0 %vm339_vm2, %v2735_v23 }
  0xa5   : > { %2032 = vmatmul.mubr.msk.bf16.vlgmr.msra.gmra.mrb[8].mxu1 %vm339_vm2, %v2659_v61 }
  0xa6   : > { %2035 = vmatprep.mubr.msk.bf16.mxu1 %vm339_vm2, %v2686_v42 }
  0xa9   : > { %2104 = vmatmul.mubr.msk.bf16.gmra.mrb[8].mxu0 %vm339_vm2, %v2742_v24 }
  0xaa   : > { %2107 = vmatprep.mubr.msk.bf16.mxu0 %vm339_vm2, %v2771_v38 }
  0xad   : > { %2036 = vmatmul.mubr.msk.bf16.gmra.mrb[12].mxu1 %vm339_vm2, %v928_v8 }
  0xb1   : > { %2108 = vmatmul.mubr.msk.bf16.gmra.mrb[12].mxu0 %vm339_vm2, %v1440_v20 }
 0x158   : > { %v2007_v3 = vpop.f32.mrb[0].mxu1 }
 0x159   : > { %v839_v14 = vpop.f32.mrb[1].mxu1 }
 0x15a   : > { %v2008_v28 = vpop.f32.mrb[2].mxu1 }
 0x15b   : > { %v842_v37 = vpop.f32.mrb[3].mxu1 }
 0x160   : > { %v2011_v56 = vpop.f32.mrb[4].mxu1 }
 0x161   : > { %v855_v16 = vpop.f32.mrb[5].mxu1 }
 0x162   : > { %v2012_v31 = vpop.f32.mrb[6].mxu1 }
 0x163   : > { %v858_v32 = vpop.f32.mrb[7].mxu1 }
 0x16c   : > { %v2097_v59 = vpop.f32.mrb[0].mxu0 }
 0x16d   : > { %v2113_v61 = vadd.f32 %v2097_v59, %v2007_v3  ;;  %v1483_v2 = vpop.f32.mrb[1].mxu0 }
 0x16e   : > { %v2114_v12 = vadd.f32 %v1483_v2, %v839_v14  ;;  %v2098_v54 = vpop.f32.mrb[2].mxu0 }
 0x16f   : > { %v2115_v42 = vadd.f32 %v2098_v54, %v2008_v28  ;;  %v1486_v35 = vpop.f32.mrb[3].mxu0  ;;  %v1604_v43 = vmul.f32 %v2113_v61, %v2113_v61  ;;  %v1566_v60 = vsel %vm1562_vm4, %v2113_v61, 0.0 }
 0x170   : > { %v1602_v36 = vmul.f32 %v2114_v12, %v2114_v12  ;;  %v2116_v39 = vadd.f32 %v1486_v35, %v842_v37  ;;  %v1563_v34 = vsel %vm1562_vm4, %v2114_v12, 0.0 }
 0x171   : > { %v1605_v40 = vmul.f32 %v2115_v42, %v2115_v42  ;;  %v1621_v18 = vsel %vm1562_vm4, %v1604_v43, 0.0  ;;  %v1568_v19 = vsel %vm1562_vm4, %v2115_v42, 0.0 }
 0x172   : > { %v1564_v50 = vsel %vm1562_vm4, %v2116_v39, 0.0  ;;  %v1603_v52 = vmul.f32 %v2116_v39, %v2116_v39  ;;  %v1618_v53 = vsel %vm1562_vm4, %v1602_v36, 0.0 }
 0x173   : > { %v1565_v41 = vadd.f32 %v1564_v50, %v1563_v34  ;;  %v1623_v23 = vsel %vm1562_vm4, %v1605_v40, 0.0 }
 0x174   : > { %v1619_v58 = vsel %vm1562_vm4, %v1603_v52, 0.0  ;;  %v2101_v48 = vpop.f32.mrb[4].mxu0 }
 0x175   : > { %v1567_v62 = vadd.f32 %v1566_v60, %v1565_v41  ;;  %v1620_v63 = vadd.f32 %v1619_v58, %v1618_v53  ;;  %v2117_v0 = vadd.f32 %v2101_v48, %v2011_v56  ;;  %v1499_v5 = vpop.f32.mrb[5].mxu0 }
 0x176   : > { %v2118_v21 = vadd.f32 %v1499_v5, %v855_v16  ;;  %v2102_v22 = vpop.f32.mrb[6].mxu0 }
 0x177   : > { %v1622_v51 = vadd.f32 %v1621_v18, %v1620_v63  ;;  %v1569_v24 = vadd.f32 %v1568_v19, %v1567_v62  ;;  %v1502_v25 = vpop.f32.mrb[7].mxu0  ;;  %v2119_v4 = vadd.f32 %v2102_v22, %v2012_v31  ;;  %v1608_v44 = vmul.f32 %v2117_v0, %v2117_v0 }
 0x178   : > { %v1570_v55 = vsel %vm1562_vm4, %v2118_v21, 0.0  ;;  %v1606_v47 = vmul.f32 %v2118_v21, %v2118_v21  ;;  %v2120_v13 = vadd.f32 %v1502_v25, %v858_v32  ;;  %v2033_v15 = vpop.f32.mrb[8].mxu1  ;;  %v1574_v7 = vsel %vm1562_vm4, %v2117_v0, 0.0 }
 0x179   : > { %v1571_v20 = vadd.f32 %v1570_v55, %v1569_v24  ;;  %v1624_v27 = vadd.f32 %v1623_v23, %v1622_v51  ;;  %v1003_v33 = vpop.f32.mrb[9].mxu1  ;;  %v1609_v1 = vmul.f32 %v2119_v4, %v2119_v4  ;;  %v1576_v26 = vsel %vm1562_vm4, %v2119_v4, 0.0 }
 0x17a   : > { %v1625_v38 = vsel %vm1562_vm4, %v1606_v47, 0.0  ;;  %v1572_v29 = vsel %vm1562_vm4, %v2120_v13, 0.0  ;;  %v2034_v30 = vpop.f32.mrb[10].mxu1  ;;  %v1607_v49 = vmul.f32 %v2120_v13, %v2120_v13  ;;  %v1629_v28 = vsel %vm1562_vm4, %v1608_v44, 0.0 }
 0x17b   : > { %v1626_v45 = vadd.f32 %v1625_v38, %v1624_v27  ;;  %v1573_v46 = vadd.f32 %v1572_v29, %v1571_v20  ;;  %v1006_v6 = vpop.f32.mrb[11].mxu1  ;;  %v1631_v12 = vsel %vm1562_vm4, %v1609_v1, 0.0 }
 0x17c   : > { %v2105_v9 = vpop.f32.mrb[8].mxu0  ;;  %v1627_v11 = vsel %vm1562_vm4, %v1607_v49, 0.0 }
 0x17d   : > { %v1575_v10 = vadd.f32 %v1574_v7, %v1573_v46  ;;  %v2121_v57 = vadd.f32 %v2105_v9, %v2033_v15  ;;  %v1515_v17 = vpop.f32.mrb[9].mxu0  ;;  %v1628_v8 = vadd.f32 %v1627_v11, %v1626_v45 }
 0x17e   : > { %v2122_v3 = vadd.f32 %v1515_v17, %v1003_v33  ;;  %v2106_v14 = vpop.f32.mrb[10].mxu0 }
 0x17f   : > { %v1577_v37 = vadd.f32 %v1576_v26, %v1575_v10  ;;  %v2123_v56 = vadd.f32 %v2106_v14, %v2034_v30  ;;  %v1518_v16 = vpop.f32.mrb[11].mxu0  ;;  %v1630_v31 = vadd.f32 %v1629_v28, %v1628_v8  ;;  %v1612_v50 = vmul.f32 %v2121_v57, %v2121_v57 }
 0x180   : > { %v1578_v32 = vsel %vm1562_vm4, %v2122_v3, 0.0  ;;  %v1610_v59 = vmul.f32 %v2122_v3, %v2122_v3  ;;  %v2124_v61 = vadd.f32 %v1518_v16, %v1006_v6  ;;  %v2037_v2 = vpop.f32.mrb[12].mxu1  ;;  %v1582_v41 = vsel %vm1562_vm4, %v2121_v57, 0.0 }
 0x181   : > { %v1579_v54 = vadd.f32 %v1578_v32, %v1577_v37  ;;  %v1019_v42 = vpop.f32.mrb[13].mxu1  ;;  %v1632_v35 = vadd.f32 %v1631_v12, %v1630_v31  ;;  %v1613_v48 = vmul.f32 %v2123_v56, %v2123_v56  ;;  %v1584_v5 = vsel %vm1562_vm4, %v2123_v56, 0.0 }
 0x182   : > { %v1633_v36 = vsel %vm1562_vm4, %v1610_v59, 0.0  ;;  %v1580_v39 = vsel %vm1562_vm4, %v2124_v61, 0.0  ;;  %v1611_v43 = vmul.f32 %v2124_v61, %v2124_v61  ;;  %v2038_v34 = vpop.f32.mrb[14].mxu1  ;;  %v1637_v22 = vsel %vm1562_vm4, %v1612_v50, 0.0 }
 0x183   : > { %v1581_v52 = vadd.f32 %v1580_v39, %v1579_v54  ;;  %v1022_v40 = vpop.f32.mrb[15].mxu1  ;;  %v1634_v60 = vadd.f32 %v1633_v36, %v1632_v35  ;;  %v1639_v13 = vsel %vm1562_vm4, %v1613_v48, 0.0 }
 0x184   : > { %v1635_v53 = vsel %vm1562_vm4, %v1611_v43, 0.0  ;;  %v2109_v58 = vpop.f32.mrb[12].mxu0 }
 0x185   : > { %v1583_v62 = vadd.f32 %v1582_v41, %v1581_v52  ;;  %v2125_v63 = vadd.f32 %v2109_v58, %v2037_v2  ;;  %v1531_v0 = vpop.f32.mrb[13].mxu0  ;;  %v1636_v18 = vadd.f32 %v1635_v53, %v1634_v60 }
 0x186   : > { %v2126_v19 = vadd.f32 %v1531_v0, %v1019_v42  ;;  %v2110_v21 = vpop.f32.mrb[14].mxu0 }
 0x187   : > { %v1585_v23 = vadd.f32 %v1584_v5, %v1583_v62  ;;  %v2127_v51 = vadd.f32 %v2110_v21, %v2038_v34  ;;  %v1534_v24 = vpop.f32.mrb[15].mxu0  ;;  %v1638_v25 = vadd.f32 %v1637_v22, %v1636_v18  ;;  %v1616_v29 = vmul.f32 %v2125_v63, %v2125_v63 }
 0x188   : > { %v1586_v55 = vsel %vm1562_vm4, %v2126_v19, 0.0  ;;  %v1614_v47 = vmul.f32 %v2126_v19, %v2126_v19  ;;  %v2128_v4 = vadd.f32 %v1534_v24, %v1022_v40  ;;  %v1590_v44 = vsel %vm1562_vm4, %v2125_v63, 0.0 }
 0x189   : > { %v1587_v15 = vadd.f32 %v1586_v55, %v1585_v23  ;;  %v1640_v20 = vadd.f32 %v1639_v13, %v1638_v25  ;;  %v1617_v49 = vmul.f32 %v2127_v51, %v2127_v51  ;;  %v1592_v7 = vsel %vm1562_vm4, %v2127_v51, 0.0 }
 0x18a   : > { %v1641_v27 = vsel %vm1562_vm4, %v1614_v47, 0.0  ;;  %v1588_v33 = vsel %vm1562_vm4, %v2128_v4, 0.0  ;;  %v1615_v38 = vmul.f32 %v2128_v4, %v2128_v4  ;;  %v1645_v1 = vsel %vm1562_vm4, %v1616_v29, 0.0 }
 0x18b   : > { %v1589_v30 = vadd.f32 %v1588_v33, %v1587_v15  ;;  %v1642_v45 = vadd.f32 %v1641_v27, %v1640_v20  ;;  %v1647_v57 = vsel %vm1562_vm4, %v1617_v49, 0.0 }
 0x18c   : > { %v1643_v46 = vsel %vm1562_vm4, %v1615_v38, 0.0 }
 0x18d   : > { %v1591_v6 = vadd.f32 %v1590_v44, %v1589_v30  ;;  %v1644_v9 = vadd.f32 %v1643_v46, %v1642_v45 }
 0x18f   : > { %v1593_v10 = vadd.f32 %v1592_v7, %v1591_v6  ;;  %v1646_v11 = vadd.f32 %v1645_v1, %v1644_v9 }
 0x191   : > { %v1594_v17 = vrot.slane %v1593_v10, 4  ;;  %v1648_v26 = vadd.f32 %v1647_v57, %v1646_v11 }
 0x193   : > { %v1595_v8 = vadd.f32 %v1594_v17, %v1593_v10  ;;  %v1649_v3 = vrot.slane %v1648_v26, 4 }
 0x195   : > { %v1596_v14 = vrot.slane %v1595_v8, 2  ;;  %v1650_v28 = vadd.f32 %v1649_v3, %v1648_v26 }
 0x197   : > { %v1597_v37 = vadd.f32 %v1596_v14, %v1595_v8  ;;  %v1651_v56 = vrot.slane %v1650_v28, 2 }
 0x199   : > { %v1598_v16 = vrot.slane %v1597_v37, 1  ;;  %v1652_v31 = vadd.f32 %v1651_v56, %v1650_v28 }
 0x19b   : > { %v1599_v32 = vadd.f32 %v1598_v16, %v1597_v37  ;;  %v1653_v59 = vrot.slane %v1652_v31, 1 }
 0x19d   : > { %1601 = vst.msk [vmem:[%s166_s4] sm:$0x1] %vm1600_vm5, %v1599_v32 }
 0x19e   : > { %2329 = shalt.err (!%p2326_p3)
}
 0x19f   : > { %s2330_s27 = scalar_lea.hbm %s2942_s10, 16  ;;  %s2334_s4 = scalar_lea.hbm %s3020_s2, 64 }
 0x1a0   : > { %p2331_p4 = scmp.ne.s32.totalorder %s2942_s10, %s2330_s27  ;;  %p2335_p9 = scmp.lt.u32.totalorder %s2942_s10, %s3020_s2 }
 0x1a1   : > { %p2336_p10 = scmp.lt.u32.totalorder %s2334_s4, %s2330_s27  ;;  %p2338_p12 = scmp.lt.u32.totalorder %s2330_s27, %s2942_s10 }
 0x1a2   : > { %p2332_p7 = pnand %p2331_p4, %p2472_p5 }
 0x1a3   : > { %p2337_p11 = por %p2336_p10, %p2335_p9 }
 0x1a4   : > { %p2333_p8 = pneg %p2332_p7 }
 0x1a5   : > { %p2339_p13 = por %p2338_p12, %p2337_p11 }
 0x1a7   : > { %p2340_p0 = pnand %p2339_p13, %p2333_p8 }
 0x1a9   : > { %2343 = shalt.err (!%p2340_p0)
}
 0x1aa   : > { %2252 = dma.vmem_to_hbm [thread:$0]  (%p2472_p5), %s2944_s5, 16, %s2942_s10, %s1657_s19   ;;  %v1654_v61 = vadd.f32 %v1653_v59, %v1652_v31 }
 0x1ab   : > { %s1661_s16 = scalar_lea.sflag [#allocation5], %s2932_s29  ;;  %s2344_s11 = scalar_lea.vmem %s2952_s7, 16 }
 0x1ac   : > { %1655 = vst.msk [vmem:[%s172_s6] sm:$0x1] %vm1600_vm5, %v1654_v61  ;;  %p2345_p1 = scmp.ne.s32.totalorder %s2952_s7, %s2344_s11  ;;  %s2413_s20 = smov [#allocation4]  }
 0x1ad   : > { %s2348_s24 = sshll.u32 %s2413_s20, 4  ;;  %s2349_s24 = int_to_ptr.vmem [resolvable:$false] %s2348_s24 }
 0x1ae   : > { %p2346_p2 = pnand %p2345_p1, %p2472_p5  ;;  %s2350_s25 = scalar_lea.vmem %s2349_s24, 32 }
 0x1af   : > { %p2351_p4 = scmp.lt.s32.totalorder %s2952_s7, %s2349_s24  ;;  %p2352_p7 = scmp.lt.s32.totalorder %s2350_s25, %s2344_s11 }
 0x1b0   : > { %p2347_p3 = pneg %p2346_p2 }
 0x1b1   : > { %p2353_p8 = por %p2352_p7, %p2351_p4 }
 0x1b3   : > { %p2354_p9 = pnand %p2353_p8, %p2347_p3 }
 0x1b5   : > { %2357 = shalt.err (!%p2354_p9)
}
 0x1b6   : > { %s2358_s29 = scalar_lea.hbm %s2950_s17, 16  ;;  %s2362_s10 = scalar_lea.hbm %s3021_s3, 64 }
 0x1b7   : > { %p2359_p10 = scmp.ne.s32.totalorder %s2950_s17, %s2358_s29  ;;  %p2363_p13 = scmp.lt.u32.totalorder %s2950_s17, %s3021_s3 }
 0x1b8   : > { %p2364_p0 = scmp.lt.u32.totalorder %s2362_s10, %s2358_s29  ;;  %p2366_p2 = scmp.lt.u32.totalorder %s2358_s29, %s2950_s17 }
 0x1b9   : > { %p2360_p11 = pnand %p2359_p10, %p2472_p5 }
 0x1ba   : > { %p2365_p1 = por %p2364_p0, %p2363_p13 }
 0x1bb   : > { %p2361_p12 = pneg %p2360_p11 }
 0x1bc   : > { %p2367_p3 = por %p2366_p2, %p2365_p1 }
 0x1be   : > { %p2368_p4 = pnand %p2367_p3, %p2361_p12 }
 0x1c0   : > { %2371 = shalt.err (!%p2368_p4)
}
 0x1c1   : > { %2253 = dma.vmem_to_hbm [thread:$0]  (%p2472_p5), %s2952_s7, 16, %s2950_s17, %s1661_s16  }
 0x1c2 PF: > { %p2263_p7 = scmp.ge.s32.totalorder %s2410_s15, 2  ;;  %s1698_s27 = sand.u32 1, %s2398_s12  }
 0x1c3   : > { %s1699_s28 = scalar_lea.sflag [#allocation3], %s1698_s27 }
 0x1c4   : > { %p2257_p8 = pnand %p2263_p7, %p2476_p6 }
 0x1c6   : > { %2389 = dma.done.wait (!%p2257_p8), %s1699_s28, 16  }
 0x1c7   : > { %2391 = vsyncadd (!%p2257_p8), %s1699_s28, 4294967280  ;;  %s1707_s30 = scalar_lea.sflag [#allocation5], %s1698_s27 }
 0x1c8   : > { %2393 = dma.done.wait (!%p2257_p8), %s1707_s30, 16  }
 0x1c9   : > { %2395 = vsyncadd (!%p2257_p8), %s1707_s30, 4294967280  ;;  %p17_p5 = scmp.ge.s32.totalorder %s2459_s18, 6   ;;  %s3024_s12 = smov %s2402_s13 }
 0x1ca   : > { %s3025_s13 = smov %s2406_s14  ;;  %s3026_s14 = smov %s2470_s21 }
 0x1cb   : > { %s3027_s15 = smov %s2459_s18  ;;  %19 = sbr.rel (!%p17_p5) target bundleno = 5 (0x5), region = 88 }
 0x1d2   :  { %1711 = vsyncpa [#allocation3], 1 }
 0x1d3   :  { %1713 = vsyncpa [#allocation3 + $0x1], 1 }
 0x1d4   :  { %1714 = vsyncpa [#allocation5], 1 }
 0x1d5   :  { %1716 = vsyncpa [#allocation5 + $0x1], 1 }

</bundles_post_ra>
